<compile_context>
chip_gen: v7x
topology: tpu7x:2x2x1
jax: 0.10.0
libtpu: 0.0.40
codegen_flags: <defaults>
</compile_context>

<pallas_src>
import functools

import jax
import jax.numpy as jnp
from jax import lax
from jax.experimental import pallas as pl
from jax.experimental.pallas import tpu as pltpu


def convlstm_kernel(p_ref, w_ref, b_ref, c_ref, h_out_ref, c_out_ref):
    # p_ref : (1, KKCp, HW)   im2col patches (bf16), contraction on sublanes
    # w_ref : (4*Ch, KKCp)    flattened conv weights (bf16)
    # b_ref : (4*Ch, 1)       conv bias (f32)
    # c_ref : (1, Ch, HW)     previous cell state (f32)
    # h_out_ref, c_out_ref : (1, Ch, HW)  (f32, NCHW-native / lane-dense)
    Ch = c_ref.shape[1]

    # Single fused im2col matmul on the MXU; f32 accumulation; bias folded in.
    gates = jnp.dot(w_ref[...], p_ref[0],
                    preferred_element_type=jnp.float32) + b_ref[...]

    # Gate order matches the PyTorch module: (in, forget, out, cell).
    # Row slices (Ch sublanes each) -> no lane shuffles.
    in_g = jax.nn.sigmoid(gates[0 * Ch:1 * Ch, :])
    f_g = jax.nn.sigmoid(gates[1 * Ch:2 * Ch, :])
    o_g = jax.nn.sigmoid(gates[2 * Ch:3 * Ch, :])
    c_g = jnp.tanh(gates[3 * Ch:4 * Ch, :])

    cell = f_g * c_ref[0] + in_g * c_g
    c_out_ref[0] = cell
    h_out_ref[0] = o_g * jnp.tanh(cell)


@functools.partial(jax.jit, static_argnames=("kernel_size",))
def conv_lstm_cell(input_nchw, prev_hidden_nchw, prev_cell_nchw,
                   weight_oikk, bias, *, kernel_size=3):
    """Pallas ConvLSTM cell. All tensors in NCHW / PyTorch layouts."""
    K = kernel_size
    pad = (K - 1) // 2
    B, Cin, H, W = input_nchw.shape
    Ch = prev_hidden_nchw.shape[1]
    Ctot = Cin + Ch
    HW = H * W
    assert weight_oikk.shape == (4 * Ch, Ctot, K, K)

    # ---- wrapper-side glue (plain JAX): concat, pad, im2col, flatten ----
    stacked = jnp.concatenate([input_nchw, prev_hidden_nchw], axis=1)
    sp = jnp.pad(stacked, ((0, 0), (0, 0), (pad, pad), (pad, pad)))
    # patches[b, (c*K + dy)*K + dx, y*W + x] = sp[b, c, y+dy, x+dx]
    taps = jnp.stack([sp[:, :, dy:dy + H, dx:dx + W]
                      for dy in range(K) for dx in range(K)], axis=2)
    patches = taps.reshape(B, Ctot * K * K, HW)

    w_flat = weight_oikk.reshape(4 * Ch, Ctot * K * K)

    # Pad contraction axis to a bf16 sublane multiple (zeros contribute 0).
    KKC = Ctot * K * K
    KKCp = ((KKC + 15) // 16) * 16
    patches = jnp.pad(patches, ((0, 0), (0, KKCp - KKC), (0, 0)))
    w_flat = jnp.pad(w_flat, ((0, 0), (0, KKCp - KKC)))

    # bf16 on the MXU operands only; state / bias / gate math stay f32.
    patches = patches.astype(jnp.bfloat16)
    w_flat = w_flat.astype(jnp.bfloat16)
    bias2d = bias.reshape(4 * Ch, 1).astype(jnp.float32)
    prev_c = prev_cell_nchw.reshape(B, Ch, HW).astype(jnp.float32)

    h_flat, c_flat = pl.pallas_call(
        convlstm_kernel,
        out_shape=(
            jax.ShapeDtypeStruct((B, Ch, HW), jnp.float32),
            jax.ShapeDtypeStruct((B, Ch, HW), jnp.float32),
        ),
        grid_spec=pltpu.PrefetchScalarGridSpec(
            num_scalar_prefetch=0,
            grid=(B,),
            in_specs=[
                pl.BlockSpec((1, KKCp, HW), lambda b: (b, 0, 0)),
                pl.BlockSpec((4 * Ch, KKCp), lambda b: (0, 0)),
                pl.BlockSpec((4 * Ch, 1), lambda b: (0, 0)),
                pl.BlockSpec((1, Ch, HW), lambda b: (b, 0, 0)),
            ],
            out_specs=(
                pl.BlockSpec((1, Ch, HW), lambda b: (b, 0, 0)),
                pl.BlockSpec((1, Ch, HW), lambda b: (b, 0, 0)),
            ),
        ),
        compiler_params=pltpu.CompilerParams(
            dimension_semantics=("parallel",)),
    )(patches, w_flat, bias2d, prev_c)

    # Outputs are already channel-major (NCHW) -> reshape only, no transpose.
    return (h_flat.reshape(B, Ch, H, W), c_flat.reshape(B, Ch, H, W))


def conv_lstm_cell_ref(input_nchw, prev_hidden_nchw, prev_cell_nchw,
                       weight_oikk, bias, compute_dtype=jnp.bfloat16):
    """Pure-JAX reference matching the PyTorch forward (no peephole).

    MXU operands are rounded through `compute_dtype` exactly like the kernel
    so the comparison tests kernel logic, not bf16 quantization.
    """
    stacked = jnp.concatenate([input_nchw, prev_hidden_nchw], axis=1)
    stacked = stacked.astype(compute_dtype).astype(jnp.float32)
    w = weight_oikk.astype(compute_dtype).astype(jnp.float32)
    gates = lax.conv_general_dilated(
        stacked, w, window_strides=(1, 1), padding="SAME",
        dimension_numbers=("NCHW", "OIHW", "NCHW"))
    gates = gates + bias.reshape(1, -1, 1, 1)
    Ch = prev_hidden_nchw.shape[1]
    in_g = jax.nn.sigmoid(gates[:, 0 * Ch:1 * Ch])
    f_g = jax.nn.sigmoid(gates[:, 1 * Ch:2 * Ch])
    o_g = jax.nn.sigmoid(gates[:, 2 * Ch:3 * Ch])
    c_g = jnp.tanh(gates[:, 3 * Ch:4 * Ch])
    cell = f_g * prev_cell_nchw + in_g * c_g
    hidden = o_g * jnp.tanh(cell)
    return hidden, cell


if __name__ == "__main__":
    # TODO(synk): peephole_connection branch not implemented (the reference
    # module never assigns self.peephole_connection, so only the non-peephole
    # path reproduced here is reachable).
    B, Cin, H, W = 2, 4, 16, 16
    Ch = 8               # hidden_size
    K = 3                # kernel_size
    Ctot = Cin + Ch

    key = jax.random.PRNGKey(0)
    kx, kh, kc, kw, kb = jax.random.split(key, 5)
    x = jax.random.normal(kx, (B, Cin, H, W), jnp.float32)
    prev_h = jax.random.normal(kh, (B, Ch, H, W), jnp.float32)
    prev_c = jax.random.normal(kc, (B, Ch, H, W), jnp.float32)
    # Conv parameters in the PyTorch Conv2d layout: (4*Ch, Cin+Ch, K, K).
    w = jax.random.normal(kw, (4 * Ch, Ctot, K, K), jnp.float32) * 0.1
    b = jax.random.normal(kb, (4 * Ch,), jnp.float32) * 0.1

    hidden, cell = conv_lstm_cell(x, prev_h, prev_c, w, b, kernel_size=K)
    jax.block_until_ready((hidden, cell))

    hidden_ref, cell_ref = conv_lstm_cell_ref(x, prev_h, prev_c, w, b)
    assert jnp.allclose(hidden, hidden_ref, atol=1e-4, rtol=1e-4), (
        float(jnp.max(jnp.abs(hidden - hidden_ref))))
    assert jnp.allclose(cell, cell_ref, atol=1e-4, rtol=1e-4), (
        float(jnp.max(jnp.abs(cell - cell_ref))))

    print("KERNEL_OK")
</pallas_src>

<mosaic_0001>
module attributes {stable_mosaic.version = 11 : i64} {
  func.func @convlstm_kernel(%arg0: i32, %arg1: memref<1x112x256xbf16, #tpu.memory_space<vmem>>, %arg2: memref<32x112xbf16, #tpu.memory_space<vmem>>, %arg3: memref<32x1xf32, #tpu.memory_space<vmem>>, %arg4: memref<1x8x256xf32, #tpu.memory_space<vmem>>, %arg5: memref<1x8x256xf32, #tpu.memory_space<vmem>>, %arg6: memref<1x8x256xf32, #tpu.memory_space<vmem>>) attributes {dimension_semantics = [#tpu.dimension_semantics<parallel>], iteration_bounds = array<i64: 2>, scalar_prefetch = 0 : i64, scratch_operands = 0 : i64, tpu.core_type = #tpu.core_type<tc>, window_params = [{transform_indices = @transform_0, window_bounds = array<i64: 1, 112, 256>}, {pipeline_mode = #tpu.pipeline_mode<synchronous>, transform_indices = @transform_1, window_bounds = array<i64: 32, 112>}, {pipeline_mode = #tpu.pipeline_mode<synchronous>, transform_indices = @transform_2, window_bounds = array<i64: 32, 1>}, {transform_indices = @transform_3, window_bounds = array<i64: 1, 8, 256>}, {transform_indices = @transform_4, window_bounds = array<i64: 1, 8, 256>}, {transform_indices = @transform_5, window_bounds = array<i64: 1, 8, 256>}]} {
    %c0 = arith.constant 0 : index
    %c0_0 = arith.constant 0 : index
    %0 = vector.load %arg2[%c0, %c0_0] : memref<32x112xbf16, #tpu.memory_space<vmem>>, vector<32x112xbf16>
    %c0_1 = arith.constant 0 : index
    %c0_2 = arith.constant 0 : index
    %c0_3 = arith.constant 0 : index
    %1 = vector.load %arg1[%c0_1, %c0_2, %c0_3] : memref<1x112x256xbf16, #tpu.memory_space<vmem>>, vector<1x112x256xbf16>
    %2 = vector.shape_cast %1 : vector<1x112x256xbf16> to vector<112x256xbf16>
    %cst = arith.constant dense<0.000000e+00> : vector<32x256xf32>
    %3 = tpu.matmul %0, %2, %cst {dimension_numbers = #tpu.dot_dimension_numbers<[1], [0], [0], [1], [0, 0, 1, 1], [], []>} : vector<32x112xbf16>, vector<112x256xbf16>, vector<32x256xf32> -> vector<32x256xf32>
    %c0_4 = arith.constant 0 : index
    %c0_5 = arith.constant 0 : index
    %4 = vector.load %arg3[%c0_4, %c0_5] : memref<32x1xf32, #tpu.memory_space<vmem>>, vector<32x1xf32>
    %5 = vector.broadcast %4 : vector<32x1xf32> to vector<32x256xf32>
    %6 = arith.addf %3, %5 : vector<32x256xf32>
    %7 = vector.extract_strided_slice %6 {offsets = [0, 0], sizes = [8, 256], strides = [1, 1]} : vector<32x256xf32> to vector<8x256xf32>
    %8 = arith.negf %7 : vector<8x256xf32>
    %9 = math.exp %8 : vector<8x256xf32>
    %cst_6 = arith.constant 1.000000e+00 : f32
    %10 = vector.broadcast %cst_6 : f32 to vector<8x256xf32>
    %11 = arith.addf %10, %9 : vector<8x256xf32>
    %12 = arith.divf %10, %11 : vector<8x256xf32>
    %13 = vector.extract_strided_slice %6 {offsets = [8, 0], sizes = [8, 256], strides = [1, 1]} : vector<32x256xf32> to vector<8x256xf32>
    %14 = arith.negf %13 : vector<8x256xf32>
    %15 = math.exp %14 : vector<8x256xf32>
    %cst_7 = arith.constant 1.000000e+00 : f32
    %16 = vector.broadcast %cst_7 : f32 to vector<8x256xf32>
    %17 = arith.addf %16, %15 : vector<8x256xf32>
    %18 = arith.divf %16, %17 : vector<8x256xf32>
    %19 = vector.extract_strided_slice %6 {offsets = [16, 0], sizes = [8, 256], strides = [1, 1]} : vector<32x256xf32> to vector<8x256xf32>
    %20 = arith.negf %19 : vector<8x256xf32>
    %21 = math.exp %20 : vector<8x256xf32>
    %cst_8 = arith.constant 1.000000e+00 : f32
    %22 = vector.broadcast %cst_8 : f32 to vector<8x256xf32>
    %23 = arith.addf %22, %21 : vector<8x256xf32>
    %24 = arith.divf %22, %23 : vector<8x256xf32>
    %25 = vector.extract_strided_slice %6 {offsets = [24, 0], sizes = [8, 256], strides = [1, 1]} : vector<32x256xf32> to vector<8x256xf32>
    %26 = math.tanh %25 : vector<8x256xf32>
    %c0_9 = arith.constant 0 : index
    %c0_10 = arith.constant 0 : index
    %c0_11 = arith.constant 0 : index
    %27 = vector.load %arg4[%c0_9, %c0_10, %c0_11] : memref<1x8x256xf32, #tpu.memory_space<vmem>>, vector<1x8x256xf32>
    %28 = vector.shape_cast %27 : vector<1x8x256xf32> to vector<8x256xf32>
    %29 = arith.mulf %18, %28 : vector<8x256xf32>
    %30 = arith.mulf %12, %26 : vector<8x256xf32>
    %31 = arith.addf %29, %30 : vector<8x256xf32>
    %c0_12 = arith.constant 0 : index
    %c0_13 = arith.constant 0 : index
    %c0_14 = arith.constant 0 : index
    %32 = vector.load %arg6[%c0_12, %c0_13, %c0_14] : memref<1x8x256xf32, #tpu.memory_space<vmem>>, vector<1x8x256xf32>
    %33 = vector.shape_cast %32 : vector<1x8x256xf32> to vector<8x256xf32>
    %34 = vector.shape_cast %31 : vector<8x256xf32> to vector<1x8x256xf32>
    tpu.vector_store %arg6[%c0_12, %c0_13, %c0_14], %34 {strides = array<i32>} : memref<1x8x256xf32, #tpu.memory_space<vmem>>, vector<1x8x256xf32>,
    %35 = math.tanh %31 : vector<8x256xf32>
    %36 = arith.mulf %24, %35 : vector<8x256xf32>
    %c0_15 = arith.constant 0 : index
    %c0_16 = arith.constant 0 : index
    %c0_17 = arith.constant 0 : index
    %37 = vector.load %arg5[%c0_15, %c0_16, %c0_17] : memref<1x8x256xf32, #tpu.memory_space<vmem>>, vector<1x8x256xf32>
    %38 = vector.shape_cast %37 : vector<1x8x256xf32> to vector<8x256xf32>
    %39 = vector.shape_cast %36 : vector<8x256xf32> to vector<1x8x256xf32>
    tpu.vector_store %arg5[%c0_15, %c0_16, %c0_17], %39 {strides = array<i32>} : memref<1x8x256xf32, #tpu.memory_space<vmem>>, vector<1x8x256xf32>,
    return
  }
  func.func @transform_0(%arg0: i32) -> (i32, i32, i32) {
    %c0_i32 = arith.constant 0 : i32
    %c0_i32_0 = arith.constant 0 : i32
    %c0_i32_1 = arith.constant 0 : i32
    return %arg0, %c0_i32, %c0_i32_0 : i32, i32, i32
  }
  func.func @transform_1(%arg0: i32) -> (i32, i32) {
    %c0_i32 = arith.constant 0 : i32
    %c0_i32_0 = arith.constant 0 : i32
    %c0_i32_1 = arith.constant 0 : i32
    return %c0_i32, %c0_i32_0 : i32, i32
  }
  func.func @transform_2(%arg0: i32) -> (i32, i32) {
    %c0_i32 = arith.constant 0 : i32
    %c0_i32_0 = arith.constant 0 : i32
    %c0_i32_1 = arith.constant 0 : i32
    return %c0_i32, %c0_i32_0 : i32, i32
  }
  func.func @transform_3(%arg0: i32) -> (i32, i32, i32) {
    %c0_i32 = arith.constant 0 : i32
    %c0_i32_0 = arith.constant 0 : i32
    %c0_i32_1 = arith.constant 0 : i32
    return %arg0, %c0_i32, %c0_i32_0 : i32, i32, i32
  }
  func.func @transform_4(%arg0: i32) -> (i32, i32, i32) {
    %c0_i32 = arith.constant 0 : i32
    %c0_i32_0 = arith.constant 0 : i32
    %c0_i32_1 = arith.constant 0 : i32
    return %arg0, %c0_i32, %c0_i32_0 : i32, i32, i32
  }
  func.func @transform_5(%arg0: i32) -> (i32, i32, i32) {
    %c0_i32 = arith.constant 0 : i32
    %c0_i32_0 = arith.constant 0 : i32
    %c0_i32_1 = arith.constant 0 : i32
    return %arg0, %c0_i32, %c0_i32_0 : i32, i32, i32
  }
}

</mosaic_0001>

<bundles_post_ra>
// kernel: conv_lstm_cell.1
= control target key start
LH: loop header
LB: loop body
LE: loop exit
PB: predicated region body
PF: predicated region fallthrough
CT: control target
= control target key end

     0   :  { %s756_s18 = smov 0   ;;  %s822_s0 = inlined_call_operand.vmem [shape: bf16[2,112,256], index: 0, kind: input, shape index: {}]   ;;  %s823_s1 = inlined_call_operand.vmem [shape: bf16[32,112], index: 1, kind: input, shape index: {}]   ;;  %s824_s2 = inlined_call_operand.vmem [shape: f32[32,1], index: 2, kind: input, shape index: {}]   ;;  %s825_s3 = inlined_call_operand.vmem [shape: f32[2,8,256], index: 3, kind: input, shape index: {}]   ;;  %s826_s4 = inlined_call_operand.vmem [shape: f32[2,8,256], index: 4, kind: output, shape index: {0}]   ;;  %s827_s5 = inlined_call_operand.vmem [shape: f32[2,8,256], index: 5, kind: output, shape index: {1}]  }
   0x1 LB: > { %s595_s19 = sadd.s32 4294967295, %s723_s18   ;;  %p599_p0 = scmp.ge.s32.totalorder %s723_s18, 1  ;;  %s723_s18 = sphi %s756_s18, %s16_s18  }
   0x2   : > { %p200_p1 = scmp.lt.s32.totalorder %s723_s18, 3 }
   0x4   : > { %p201_p2 = pnand %p599_p0, %p200_p1 }
   0x5   : > { %p238_p3 = scmp.lt.s32.totalorder (!%p201_p2), %s595_s19, 1  ;;  %v725_v0 = vmov (!%p201_p2), 0   ;;  %v277_v1 = vld [vmem:[%s824_s2] sm:$0xff] (!%p201_p2)  ;;  %v279_v2 = vld [vmem:[%s824_s2 + $0x10] sm:$0xff] (!%p201_p2)  ;;  %v278_v3 = vld [vmem:[%s824_s2 + $0x8] sm:$0xff] (!%p201_p2)  ;;  %vm381_vm0 = vcmask (!%p201_p2), 916480  }
   0x6   : > { %204 = sbr.rel (%p201_p2) target bundleno = 307 (0x133), region = 36  ;;  %420 = vmatprep.mubr.bf16.mxu0 (!%p201_p2), %v725_v0  ;;  %430 = vmatprep.mubr.bf16.mxu1 (!%p201_p2), %v725_v0  ;;  %v280_v4 = vld [vmem:[%s824_s2 + $0x18] sm:$0xff] (!%p201_p2)  ;;  %v683_v19 = vld [vmem:[%s823_s1] sm:$0xff] (!%p201_p2)   ;;  %v684_v20 = vld [vmem:[%s823_s1 + $0x8] sm:$0xff] (!%p201_p2)  }
   0x7   : > { %660 = vset.pattern.permute.xlu0 (!%p201_p2), %v725_v0  ;;  %661 = vset.pattern.permute.xlu1 (!%p201_p2), %v725_v0 }
   0x8   : > { %283 = vperm.xlu0 (!%p201_p2), %660, %v277_v1   ;;  %293 = vperm.xlu1 (!%p201_p2), %661, %v279_v2  }
   0xc   : > { %288 = vperm.xlu0 (!%p201_p2), %660, %v278_v3   ;;  %298 = vperm.xlu1 (!%p201_p2), %661, %v280_v4  }
   0xd   : > { %s829_s19 = smov (!%p238_p3, %s595_s19), 1 }
   0xe   : > { %s650_s24 = smul.u32 112, %s829_s19  ;;  %s805_s11 = sshll.u32 %s829_s19, 4 }
   0xf   : > { %s247_s14 = scalar_lea.vmem %s825_s3, %s805_s11  ;;  %s257_s17 = scalar_lea.vmem %s827_s5, %s805_s11 }
  0x10   : > { %s782_s6 = scalar_lea.vmem %s822_s0, %s650_s24  ;;  %v479_v60 = vld [vmem:[%s247_s14] sm:$0xff]  ;;  %v480_v62 = vld [vmem:[%s247_s14 + $0x8] sm:$0xff]  ;;  %s252_s21 = scalar_lea.vmem %s826_s4, %s805_s11 }
  0x11   : > { %v662_v5 = vld [vmem:[%s782_s6 + $0x4] ss:$8 sps:$4 sm:$0xff]   ;;  %v664_v6 = vld [vmem:[%s782_s6] ss:$8 sps:$4 sm:$0xff]   ;;  %v665_v7 = vld [vmem:[%s782_s6 + $0x14] ss:$8 sps:$4 sm:$0xff]  }
  0x12   : > { %388 = vmatprep.subr.bf16.mxu0 %v662_v5  ;;  %636 = vmatprep.subr.bf16.mxu1 %v662_v5  ;;  %v667_v8 = vld [vmem:[%s782_s6 + $0x10] ss:$8 sps:$4 sm:$0xff]   ;;  %v668_v9 = vld [vmem:[%s782_s6 + $0x24] ss:$8 sps:$4 sm:$0xff]   ;;  %v670_v10 = vld [vmem:[%s782_s6 + $0x20] ss:$8 sps:$4 sm:$0xff]  }
  0x13   : > { %389 = vmatpush1.bf16.msra.mxu0 %v664_v6  ;;  %643 = vmatpush1.bf16.msra.mxu1 %v664_v6  ;;  %v671_v11 = vld [vmem:[%s782_s6 + $0x34] ss:$8 sps:$4 sm:$0xff]   ;;  %v673_v12 = vld [vmem:[%s782_s6 + $0x30] ss:$8 sps:$4 sm:$0xff]   ;;  %v674_v13 = vld [vmem:[%s782_s6 + $0x44] ss:$8 sps:$4 sm:$0xff]  }
  0x14   : > { %390 = vmatprep.subr.bf16.mxu0 %v665_v7  ;;  %637 = vmatprep.subr.bf16.mxu1 %v665_v7  ;;  %v676_v14 = vld [vmem:[%s782_s6 + $0x40] ss:$8 sps:$4 sm:$0xff]   ;;  %v677_v15 = vld [vmem:[%s782_s6 + $0x54] ss:$8 sps:$4 sm:$0xff]   ;;  %v679_v16 = vld [vmem:[%s782_s6 + $0x50] ss:$8 sps:$4 sm:$0xff]  }
  0x15   : > { %v680_v17 = vld [vmem:[%s782_s6 + $0x64] ss:$8 sps:$4 sm:$0xff]   ;;  %v682_v18 = vld [vmem:[%s782_s6 + $0x60] ss:$8 sps:$4 sm:$0xff]  }
  0x17   : > { %391 = vmatpush1.bf16.msra.mxu0 %v667_v8  ;;  %644 = vmatpush1.bf16.msra.mxu1 %v667_v8 }
  0x18   : > { %392 = vmatprep.subr.bf16.mxu0 %v668_v9  ;;  %638 = vmatprep.subr.bf16.mxu1 %v668_v9 }
  0x1b   : > { %393 = vmatpush1.bf16.msra.mxu0 %v670_v10  ;;  %645 = vmatpush1.bf16.msra.mxu1 %v670_v10 }
  0x1c   : > { %394 = vmatprep.subr.bf16.mxu0 %v671_v11  ;;  %639 = vmatprep.subr.bf16.mxu1 %v671_v11 }
  0x1f   : > { %395 = vmatpush1.bf16.msra.mxu0 %v673_v12  ;;  %646 = vmatpush1.bf16.msra.mxu1 %v673_v12 }
  0x20   : > { %396 = vmatprep.subr.bf16.mxu0 %v674_v13  ;;  %640 = vmatprep.subr.bf16.mxu1 %v674_v13 }
  0x23   : > { %397 = vmatpush1.bf16.msra.mxu0 %v676_v14  ;;  %647 = vmatpush1.bf16.msra.mxu1 %v676_v14 }
  0x24   : > { %398 = vmatprep.subr.bf16.mxu0 %v677_v15  ;;  %641 = vmatprep.subr.bf16.mxu1 %v677_v15 }
  0x27   : > { %399 = vmatpush1.bf16.msra.mxu0 %v679_v16  ;;  %648 = vmatpush1.bf16.msra.mxu1 %v679_v16 }
  0x28   : > { %400 = vmatprep.subr.bf16.mxu0 %v680_v17  ;;  %642 = vmatprep.subr.bf16.mxu1 %v680_v17 }
  0x2b   : > { %401 = vmatpush1.bf16.msra.mxu0 %v682_v18  ;;  %649 = vmatpush1.bf16.msra.mxu1 %v682_v18 }
  0x2e   : > { %623 = vmatmul.mubr.msk.bf16.vlgmr.msra.gmra.mrb[0].mxu0 %vm381_vm0, %v683_v19  ;;  %624 = vmatmul.mubr.msk.bf16.vlgmr.msra.gmra.mrb[0].mxu1 %vm381_vm0, %v684_v20 }
  0x87   : > { %v284_v21 = vpop.permute.xlu0 %283  ;;  %v294_v23 = vpop.permute.xlu1 %293 }
  0x8b   : > { %v289_v22 = vpop.permute.xlu0 %288  ;;  %v299_v42 = vpop.permute.xlu1 %298 }
 0x101   : > { %v422_v24 = vpop.f32.mrb[0].mxu0  ;;  %v432_v25 = vpop.f32.mrb[0].mxu1 }
 0x102   : > { %v423_v26 = vadd.f32 %v422_v24, %v284_v21  ;;  %v424_v27 = vpop.f32.mrb[1].mxu0  ;;  %v434_v28 = vpop.f32.mrb[1].mxu1  ;;  %v433_v40 = vadd.f32 %v432_v25, %v294_v23 }
 0x103   : > { %v425_v29 = vadd.f32 %v424_v27, %v284_v21  ;;  %v426_v30 = vpop.f32.mrb[2].mxu0  ;;  %v436_v31 = vpop.f32.mrb[2].mxu1  ;;  %v435_v41 = vadd.f32 %v434_v28, %v294_v23 }
 0x104   : > { %v625_v32 = vmul.f32 -1.442695, %v423_v26  ;;  %v427_v33 = vadd.f32 %v426_v30, %v289_v22  ;;  %v428_v34 = vpop.f32.mrb[3].mxu0  ;;  %v438_v35 = vpop.f32.mrb[3].mxu1  ;;  %v629_v43 = vmul.f32 -1.442695, %v433_v40  ;;  %v437_v45 = vadd.f32 %v436_v31, %v299_v42 }
 0x105   : > { %v626_v36 = vmul.f32 -1.442695, %v425_v29  ;;  %v429_v37 = vadd.f32 %v428_v34, %v289_v22  ;;  %v630_v44 = vmul.f32 -1.442695, %v435_v41  ;;  %v439_v46 = vadd.f32 %v438_v35, %v299_v42 }
 0x106   : > { %685 = vpow2.f32 %v625_v32  ;;  %v627_v38 = vmul.f32 -1.442695, %v427_v33 }
 0x107   : > { %687 = vpow2.f32 %v626_v36  ;;  %v628_v39 = vmul.f32 -1.442695, %v429_v37 }
 0x108   : > { %689 = vpow2.f32 %v627_v38 }
 0x109   : > { %691 = vpow2.f32 %v628_v39 }
 0x10a   : > { %693 = vpow2.f32 %v629_v43 }
 0x10b   : > { %695 = vpow2.f32 %v630_v44 }
 0x10c   : > { %697 = vtanh.f32 %v437_v45 }
 0x10d   : > { %699 = vtanh.f32 %v439_v46 }
 0x110   : > { %v686_v47 = vpop.eup %685 }
 0x111   : > { %v688_v48 = vpop.eup %687  ;;  %v447_v49 = vadd.f32 1.0, %v686_v47 }
 0x112   : > { %v690_v50 = vpop.eup %689  ;;  %v448_v51 = vadd.f32 1.0, %v688_v48 }
 0x113   : > { %v692_v52 = vpop.eup %691  ;;  %701 = vrcp.f32 %v447_v49  ;;  %v459_v53 = vadd.f32 1.0, %v690_v50 }
 0x114   : > { %703 = vrcp.f32 %v448_v51  ;;  %v460_v54 = vadd.f32 1.0, %v692_v52  ;;  %v694_v55 = vpop.eup %693 }
 0x115   : > { %705 = vrcp.f32 %v459_v53  ;;  %v696_v56 = vpop.eup %695  ;;  %v471_v63 = vadd.f32 1.0, %v694_v55 }
 0x116   : > { %707 = vrcp.f32 %v460_v54  ;;  %v698_v57 = vpop.eup %697  ;;  %v472_v2 = vadd.f32 1.0, %v696_v56 }
 0x117   : > { %v700_v58 = vpop.eup %699  ;;  %709 = vrcp.f32 %v471_v63 }
 0x118   : > { %711 = vrcp.f32 %v472_v2 }
 0x11d   : > { %v702_v59 = vpop.eup %701 }
 0x11e   : > { %v704_v61 = vpop.eup %703  ;;  %v483_v0 = vmul.f32 %v702_v59, %v698_v57 }
 0x11f   : > { %v706_v1 = vpop.eup %705  ;;  %v484_v3 = vmul.f32 %v704_v61, %v700_v58 }
 0x120   : > { %v708_v4 = vpop.eup %707  ;;  %v481_v5 = vmul.f32 %v706_v1, %v479_v60 }
 0x121   : > { %v482_v6 = vmul.f32 %v708_v4, %v480_v62  ;;  %v710_v9 = vpop.eup %709 }
 0x122   : > { %v485_v7 = vadd.f32 %v483_v0, %v481_v5  ;;  %v712_v10 = vpop.eup %711 }
 0x123   : > { %v486_v8 = vadd.f32 %v484_v3, %v482_v6 }
 0x124   : > { %487 = vst [vmem:[%s257_s17] sm:$0xff] %v485_v7  ;;  %713 = vtanh.f32 %v485_v7 }
 0x125   : > { %488 = vst [vmem:[%s257_s17 + $0x8] sm:$0xff] %v486_v8  ;;  %715 = vtanh.f32 %v486_v8 }
 0x12e   : > { %v714_v11 = vpop.eup %713 }
 0x12f   : > { %v716_v12 = vpop.eup %715  ;;  %v491_v13 = vmul.f32 %v714_v11, %v710_v9 }
 0x130   : > { %v492_v14 = vmul.f32 %v716_v12, %v712_v10 }
 0x131   : > { %493 = vst [vmem:[%s252_s21] sm:$0xff] %v491_v13 }
 0x132   : > { %494 = vst [vmem:[%s252_s21 + $0x8] sm:$0xff] %v492_v14 }
 0x133 PF: > { %s16_s18 = sadd.s32 1, %s723_s18  }
 0x134   : > { %p13_p4 = scmp.ge.s32.totalorder %s16_s18, 4  }
 0x136   :  { %15 = sbr.rel (!%p13_p4) target bundleno = 1 (0x1), region = 81 }

</bundles_post_ra>
